<compile_context>
chip_gen: v7x
topology: tpu7x:2x2x1
jax: 0.10.0
libtpu: 0.0.40
codegen_flags: <defaults>
</compile_context>

<pallas_src>
import functools

import jax
import jax.numpy as jnp
import numpy as np
from jax.experimental import pallas as pl
from jax.experimental.pallas import tpu as pltpu


def _round_up(x, m):
    return (x + m - 1) // m * m


# ----------------------------- Pallas kernel ------------------------------ #
def textcnn_kernel(tok_ref, wconv_ref, bconv_ref, tmax_ref, wfc_ref, bfc_ref,
                   out_ref, *, seq_len):
    """One grid step computes logits for a tile of TB batch rows.

    tok_ref  : (TB*S, kmax) int32 — token id at position t+j (column j), or a
               sentinel id (== V, padded zero row) when t+j >= S.
    wconv_ref: (kmax, Vp, NFp) bf16 — pre-fused (embedding @ conv) weights.
    bconv_ref: (1, NFp) f32 conv bias (zero in padded columns).
    tmax_ref : (1, NFp) int32 — last valid time index S-k per column, -1 for
               padded columns.
    wfc_ref  : (NFp, Cp) bf16, bfc_ref : (1, Cp) f32.
    out_ref  : (TB, Cp) f32 logits (padded columns are zero).
    """
    tbs, kmax = tok_ref.shape
    _, vp, nfp = wconv_ref.shape
    tb = tbs // seq_len

    tok = tok_ref[...]                                            # (TBS, kmax)
    viota = jax.lax.broadcasted_iota(jnp.int32, (tbs, vp), 1)     # (TBS, Vp)

    # Fused embedding-gather + conv: one accumulating bf16 MXU pass per row
    # offset j.  The one-hot row for the sentinel id selects an all-zero row.
    acc = jnp.zeros((tbs, nfp), jnp.float32)
    for j in range(kmax):
        onehot = (viota == tok[:, j:j + 1]).astype(jnp.bfloat16)  # (TBS, Vp)
        acc = acc + jnp.dot(onehot, wconv_ref[j],
                            preferred_element_type=jnp.float32)   # (TBS, NFp)

    y = jnp.maximum(acc + bconv_ref[...], 0.0)                    # (TBS, NFp)

    # Max over time, masking tail positions that are not valid conv outputs
    # for their column's filter size (y >= 0, so replacing with 0 is exact).
    y3 = y.reshape(tb, seq_len, nfp)
    t_iota = jax.lax.broadcasted_iota(jnp.int32, (tb, seq_len, nfp), 1)
    valid = t_iota <= tmax_ref[...].reshape(1, 1, nfp)
    feat = jnp.max(jnp.where(valid, y3, 0.0), axis=1)             # (TB, NFp)

    # TODO(synk): nn.Dropout is identity at inference time; training-mode
    #             stochastic dropout (pltpu.prng_random_bits) is not implemented.
    out_ref[...] = (jnp.dot(feat.astype(jnp.bfloat16), wfc_ref[...],
                            preferred_element_type=jnp.float32)
                    + bfc_ref[...])                               # (TB, Cp)


# --------------------------- Wrapper-side prep ----------------------------- #
def _token_im2col(tokens, kmax, sentinel):
    """(B*S, kmax) int32 with column j = token id at position t+j within the
    same batch row, or `sentinel` when t+j >= S."""
    b, s = tokens.shape
    cols = []
    for j in range(kmax):
        if j == 0:
            shifted = tokens
        else:
            shifted = jnp.concatenate(
                [tokens[:, j:], jnp.full((b, j), sentinel, tokens.dtype)], axis=1)
        cols.append(shifted.reshape(b * s, 1))
    return jnp.concatenate(cols, axis=1).astype(jnp.int32)


# ------------------------------- Forward ----------------------------------- #
def textcnn_forward(tokens, emb_table, conv_ws, conv_bs, wfc, bfc, filter_sizes):
    B, S = tokens.shape
    V, E = emb_table.shape
    F = conv_ws[0].shape[-1]
    nk = len(filter_sizes)
    NF = nk * F
    C = wfc.shape[1]
    kmax = max(filter_sizes)
    if S < kmax:
        raise ValueError("sequence length must be >= the largest filter size")

    # Lane-dense padded sizes.
    Vp = max(128, _round_up(V + 1, 128))    # +1 leaves room for the sentinel id V
    NFp = max(128, _round_up(NF, 128))
    Cp = max(128, _round_up(C, 128))

    # Fuse conv weights per row offset j: (kmax, E, NF).
    w_blocks = []
    for w in conv_ws:
        k = w.shape[0]
        w_blocks.append(jnp.pad(w, ((0, kmax - k), (0, 0), (0, 0))))
    w_fused = jnp.concatenate(w_blocks, axis=2)                   # (kmax, E, NF)
    b_fused = jnp.concatenate([b.reshape(1, F) for b in conv_bs], axis=1)

    # Pre-fold the embedding table into the conv weights (f32 on device),
    # then pad vocab / filter axes and cast to bf16 for the MXU.
    w_prime = jnp.einsum("ve,kef->kvf",
                         emb_table.astype(jnp.float32),
                         w_fused.astype(jnp.float32))             # (kmax, V, NF)
    w_prime = jnp.pad(w_prime, ((0, 0), (0, Vp - V), (0, NFp - NF)))
    w_prime = w_prime.astype(jnp.bfloat16)

    b_pad = jnp.pad(b_fused.astype(jnp.float32), ((0, 0), (0, NFp - NF)))

    # Last valid time index per (padded) filter column.
    tmax_np = np.full((1, NFp), -1, np.int32)
    for i, k in enumerate(filter_sizes):
        tmax_np[0, i * F:(i + 1) * F] = S - k
    tmax = jnp.asarray(tmax_np)

    wfc_pad = jnp.pad(wfc.astype(jnp.float32),
                      ((0, NFp - NF), (0, Cp - C))).astype(jnp.bfloat16)
    bfc_pad = jnp.pad(bfc.astype(jnp.float32), ((0, 0), (0, Cp - C)))

    tok_cols = _token_im2col(tokens, kmax, sentinel=V)            # (B*S, kmax)

    # Batch tiling: one tile here (B=2); 8-row tiles shard across TensorCores
    # for production batch sizes.
    tb = 8 if (B > 8 and B % 8 == 0) else B
    grid = (B // tb,)

    flops = 2 * kmax * B * S * Vp * NFp + 2 * B * NFp * Cp
    bytes_accessed = (4 * B * S * kmax            # token ids
                      + 2 * kmax * Vp * NFp       # fused emb-conv weights (bf16)
                      + 4 * NFp + 4 * NFp         # conv bias + tmax
                      + 2 * NFp * Cp + 4 * Cp     # fc weights + bias
                      + 4 * B * Cp)               # logits

    kernel = functools.partial(textcnn_kernel, seq_len=S)

    out = pl.pallas_call(
        kernel,
        out_shape=jax.ShapeDtypeStruct((B, Cp), jnp.float32),
        grid_spec=pltpu.PrefetchScalarGridSpec(
            num_scalar_prefetch=0,
            grid=grid,
            in_specs=[
                pl.BlockSpec((tb * S, kmax), lambda i: (i, 0)),
                pl.BlockSpec((kmax, Vp, NFp), lambda i: (0, 0, 0)),
                pl.BlockSpec((1, NFp), lambda i: (0, 0)),
                pl.BlockSpec((1, NFp), lambda i: (0, 0)),
                pl.BlockSpec((NFp, Cp), lambda i: (0, 0)),
                pl.BlockSpec((1, Cp), lambda i: (0, 0)),
            ],
            out_specs=pl.BlockSpec((tb, Cp), lambda i: (i, 0)),
        ),
        compiler_params=pltpu.CompilerParams(
            dimension_semantics=("parallel",)),
        cost_estimate=pl.CostEstimate(flops=flops, transcendentals=0,
                                      bytes_accessed=bytes_accessed),
    )(tok_cols, w_prime, b_pad, tmax, wfc_pad, bfc_pad)

    return out[:, :C]


# --------------------------- Pure-JAX reference ---------------------------- #
def textcnn_ref(tokens, emb_table, conv_ws, conv_bs, wfc, bfc):
    x = emb_table[tokens].astype(jnp.float32)                     # (B, S, E)
    feats = []
    for w, bia in zip(conv_ws, conv_bs):
        k = w.shape[0]
        L = x.shape[1] - k + 1
        acc = sum(jnp.einsum("bse,ef->bsf", x[:, j:j + L, :], w[j])
                  for j in range(k)) + bia
        acc = jnp.maximum(acc, 0.0)
        feats.append(acc.max(axis=1))                             # (B, F)
    feat = jnp.concatenate(feats, axis=1)
    return feat @ wfc + bfc


# --------------------------------- Main ------------------------------------ #
if __name__ == "__main__":
    # Small config consistent with TextCNN.
    n_vocab, embed = 50, 32
    seq_len, batch = 16, 2
    num_filters = 8
    filter_sizes = (2, 3, 4)
    num_classes = 4

    key = jax.random.PRNGKey(0)
    k_emb, k_tok, kfc_w, kfc_b, *k_convs = jax.random.split(
        key, 4 + 2 * len(filter_sizes))

    def bf16_repr(x):
        # Parameters exactly representable in bf16 so the bf16 MXU path stays
        # close to the f32 reference.
        return x.astype(jnp.bfloat16).astype(jnp.float32)

    # Embedding table; padding_idx = n_vocab - 1 row is zero (PyTorch semantics).
    emb_table = bf16_repr(0.1 * jax.random.normal(k_emb, (n_vocab, embed),
                                                  jnp.float32))
    emb_table = emb_table.at[n_vocab - 1].set(0.0)

    # Conv weights (k, E, F) and biases (1, F) per filter size.
    conv_ws, conv_bs = [], []
    for i, k in enumerate(filter_sizes):
        conv_ws.append(bf16_repr(0.1 * jax.random.normal(
            k_convs[2 * i], (k, embed, num_filters), jnp.float32)))
        conv_bs.append(bf16_repr(0.1 * jax.random.normal(
            k_convs[2 * i + 1], (1, num_filters), jnp.float32)))

    # FC layer.
    wfc = bf16_repr(0.1 * jax.random.normal(
        kfc_w, (num_filters * len(filter_sizes), num_classes), jnp.float32))
    bfc = bf16_repr(0.1 * jax.random.normal(kfc_b, (1, num_classes), jnp.float32))

    # Token ids.
    tokens = jax.random.randint(k_tok, (batch, seq_len), 0, n_vocab, jnp.int32)

    out = textcnn_forward(tokens, emb_table, conv_ws, conv_bs, wfc, bfc,
                          filter_sizes)
    out = jax.block_until_ready(out)

    ref = textcnn_ref(tokens, emb_table, conv_ws, conv_bs, wfc, bfc)
    # Tolerance covers the bf16 rounding of the pre-fused (emb @ conv) weights
    # and of the pooled features fed to the bf16 fc matmul; errors from any
    # real bug would be orders of magnitude larger than these bounds.
    np.testing.assert_allclose(np.asarray(out), np.asarray(ref),
                               rtol=1e-2, atol=5e-3)

    print("KERNEL_OK")
</pallas_src>

<mosaic_0001>
module attributes {stable_mosaic.version = 11 : i64} {
  func.func @textcnn_kernel(%arg0: i32, %arg1: memref<32x4xi32, #tpu.memory_space<vmem>>, %arg2: memref<4x128x128xbf16, #tpu.memory_space<vmem>>, %arg3: memref<1x128xf32, #tpu.memory_space<vmem>>, %arg4: memref<1x128xi32, #tpu.memory_space<vmem>>, %arg5: memref<128x128xbf16, #tpu.memory_space<vmem>>, %arg6: memref<1x128xf32, #tpu.memory_space<vmem>>, %arg7: memref<2x128xf32, #tpu.memory_space<vmem>>) attributes {dimension_semantics = [#tpu.dimension_semantics<parallel>], iteration_bounds = array<i64: 1>, scalar_prefetch = 0 : i64, scratch_operands = 0 : i64, tpu.core_type = #tpu.core_type<tc>, window_params = [{transform_indices = @transform_0, window_bounds = array<i64: 32, 4>}, {pipeline_mode = #tpu.pipeline_mode<synchronous>, transform_indices = @transform_1, window_bounds = array<i64: 4, 128, 128>}, {pipeline_mode = #tpu.pipeline_mode<synchronous>, transform_indices = @transform_2, window_bounds = array<i64: 1, 128>}, {pipeline_mode = #tpu.pipeline_mode<synchronous>, transform_indices = @transform_3, window_bounds = array<i64: 1, 128>}, {pipeline_mode = #tpu.pipeline_mode<synchronous>, transform_indices = @transform_4, window_bounds = array<i64: 128, 128>}, {pipeline_mode = #tpu.pipeline_mode<synchronous>, transform_indices = @transform_5, window_bounds = array<i64: 1, 128>}, {transform_indices = @transform_6, window_bounds = array<i64: 2, 128>}]} {
    %c0 = arith.constant 0 : index
    %c0_0 = arith.constant 0 : index
    %0 = vector.load %arg1[%c0, %c0_0] : memref<32x4xi32, #tpu.memory_space<vmem>>, vector<32x4xi32>
    %1 = tpu.iota {dimensions = array<i32: 1>} : vector<32x128xi32>
    %cst = arith.constant 0.000000e+00 : f32
    %2 = vector.broadcast %cst : f32 to vector<32x128xf32>
    %3 = vector.extract_strided_slice %0 {offsets = [0, 0], sizes = [32, 1], strides = [1, 1]} : vector<32x4xi32> to vector<32x1xi32>
    %4 = vector.broadcast %3 : vector<32x1xi32> to vector<32x128xi32>
    %5 = arith.cmpi eq, %1, %4 : vector<32x128xi32>
    %6 = arith.extui %5 : vector<32x128xi1> to vector<32x128xi32>
    %7 = arith.sitofp %6 : vector<32x128xi32> to vector<32x128xf32>
    %8 = arith.truncf %7 : vector<32x128xf32> to vector<32x128xbf16>
    %c0_1 = arith.constant 0 : index
    %c0_2 = arith.constant 0 : index
    %c0_3 = arith.constant 0 : index
    %9 = vector.load %arg2[%c0_1, %c0_2, %c0_3] : memref<4x128x128xbf16, #tpu.memory_space<vmem>>, vector<1x128x128xbf16>
    %10 = vector.shape_cast %9 : vector<1x128x128xbf16> to vector<128x128xbf16>
    %cst_4 = arith.constant dense<0.000000e+00> : vector<32x128xf32>
    %11 = tpu.matmul %8, %10, %cst_4 {dimension_numbers = #tpu.dot_dimension_numbers<[1], [0], [0], [1], [0, 0, 1, 1], [], []>} : vector<32x128xbf16>, vector<128x128xbf16>, vector<32x128xf32> -> vector<32x128xf32>
    %12 = arith.addf %2, %11 : vector<32x128xf32>
    %13 = vector.extract_strided_slice %0 {offsets = [0, 1], sizes = [32, 1], strides = [1, 1]} : vector<32x4xi32> to vector<32x1xi32>
    %14 = vector.broadcast %13 : vector<32x1xi32> to vector<32x128xi32>
    %15 = arith.cmpi eq, %1, %14 : vector<32x128xi32>
    %16 = arith.extui %15 : vector<32x128xi1> to vector<32x128xi32>
    %17 = arith.sitofp %16 : vector<32x128xi32> to vector<32x128xf32>
    %18 = arith.truncf %17 : vector<32x128xf32> to vector<32x128xbf16>
    %c1 = arith.constant 1 : index
    %c0_5 = arith.constant 0 : index
    %c0_6 = arith.constant 0 : index
    %19 = vector.load %arg2[%c1, %c0_5, %c0_6] : memref<4x128x128xbf16, #tpu.memory_space<vmem>>, vector<1x128x128xbf16>
    %20 = vector.shape_cast %19 : vector<1x128x128xbf16> to vector<128x128xbf16>
    %cst_7 = arith.constant dense<0.000000e+00> : vector<32x128xf32>
    %21 = tpu.matmul %18, %20, %cst_7 {dimension_numbers = #tpu.dot_dimension_numbers<[1], [0], [0], [1], [0, 0, 1, 1], [], []>} : vector<32x128xbf16>, vector<128x128xbf16>, vector<32x128xf32> -> vector<32x128xf32>
    %22 = arith.addf %12, %21 : vector<32x128xf32>
    %23 = vector.extract_strided_slice %0 {offsets = [0, 2], sizes = [32, 1], strides = [1, 1]} : vector<32x4xi32> to vector<32x1xi32>
    %24 = vector.broadcast %23 : vector<32x1xi32> to vector<32x128xi32>
    %25 = arith.cmpi eq, %1, %24 : vector<32x128xi32>
    %26 = arith.extui %25 : vector<32x128xi1> to vector<32x128xi32>
    %27 = arith.sitofp %26 : vector<32x128xi32> to vector<32x128xf32>
    %28 = arith.truncf %27 : vector<32x128xf32> to vector<32x128xbf16>
    %c2 = arith.constant 2 : index
    %c0_8 = arith.constant 0 : index
    %c0_9 = arith.constant 0 : index
    %29 = vector.load %arg2[%c2, %c0_8, %c0_9] : memref<4x128x128xbf16, #tpu.memory_space<vmem>>, vector<1x128x128xbf16>
    %30 = vector.shape_cast %29 : vector<1x128x128xbf16> to vector<128x128xbf16>
    %cst_10 = arith.constant dense<0.000000e+00> : vector<32x128xf32>
    %31 = tpu.matmul %28, %30, %cst_10 {dimension_numbers = #tpu.dot_dimension_numbers<[1], [0], [0], [1], [0, 0, 1, 1], [], []>} : vector<32x128xbf16>, vector<128x128xbf16>, vector<32x128xf32> -> vector<32x128xf32>
    %32 = arith.addf %22, %31 : vector<32x128xf32>
    %33 = vector.extract_strided_slice %0 {offsets = [0, 3], sizes = [32, 1], strides = [1, 1]} : vector<32x4xi32> to vector<32x1xi32>
    %34 = vector.broadcast %33 : vector<32x1xi32> to vector<32x128xi32>
    %35 = arith.cmpi eq, %1, %34 : vector<32x128xi32>
    %36 = arith.extui %35 : vector<32x128xi1> to vector<32x128xi32>
    %37 = arith.sitofp %36 : vector<32x128xi32> to vector<32x128xf32>
    %38 = arith.truncf %37 : vector<32x128xf32> to vector<32x128xbf16>
    %c3 = arith.constant 3 : index
    %c0_11 = arith.constant 0 : index
    %c0_12 = arith.constant 0 : index
    %39 = vector.load %arg2[%c3, %c0_11, %c0_12] : memref<4x128x128xbf16, #tpu.memory_space<vmem>>, vector<1x128x128xbf16>
    %40 = vector.shape_cast %39 : vector<1x128x128xbf16> to vector<128x128xbf16>
    %cst_13 = arith.constant dense<0.000000e+00> : vector<32x128xf32>
    %41 = tpu.matmul %38, %40, %cst_13 {dimension_numbers = #tpu.dot_dimension_numbers<[1], [0], [0], [1], [0, 0, 1, 1], [], []>} : vector<32x128xbf16>, vector<128x128xbf16>, vector<32x128xf32> -> vector<32x128xf32>
    %42 = arith.addf %32, %41 : vector<32x128xf32>
    %c0_14 = arith.constant 0 : index
    %c0_15 = arith.constant 0 : index
    %43 = vector.load %arg3[%c0_14, %c0_15] : memref<1x128xf32, #tpu.memory_space<vmem>>, vector<1x128xf32>
    %44 = vector.broadcast %43 : vector<1x128xf32> to vector<32x128xf32>
    %45 = arith.addf %42, %44 : vector<32x128xf32>
    %cst_16 = arith.constant 0.000000e+00 : f32
    %46 = vector.broadcast %cst_16 : f32 to vector<32x128xf32>
    %47 = arith.maximumf %45, %46 : vector<32x128xf32>
    %48 = vector.shape_cast %47 : vector<32x128xf32> to vector<2x16x128xf32>
    %49 = tpu.iota {dimensions = array<i32: 1>} : vector<2x16x128xi32>
    %c0_17 = arith.constant 0 : index
    %c0_18 = arith.constant 0 : index
    %50 = vector.load %arg4[%c0_17, %c0_18] : memref<1x128xi32, #tpu.memory_space<vmem>>, vector<1x128xi32>
    %51 = vector.shape_cast %50 : vector<1x128xi32> to vector<1x1x128xi32>
    %52 = vector.broadcast %51 : vector<1x1x128xi32> to vector<2x16x128xi32>
    %53 = arith.cmpi sle, %49, %52 : vector<2x16x128xi32>
    %cst_19 = arith.constant 0.000000e+00 : f32
    %54 = vector.broadcast %cst_19 : f32 to vector<2x16x128xf32>
    %55 = arith.select %53, %48, %54 : vector<2x16x128xi1>, vector<2x16x128xf32>
    %cst_20 = arith.constant dense<0xFF800000> : vector<2x128xf32>
    %56 = vector.multi_reduction <maximumf>, %55, %cst_20 [1] : vector<2x16x128xf32> to vector<2x128xf32>
    %57 = arith.truncf %56 : vector<2x128xf32> to vector<2x128xbf16>
    %c0_21 = arith.constant 0 : index
    %c0_22 = arith.constant 0 : index
    %58 = vector.load %arg5[%c0_21, %c0_22] : memref<128x128xbf16, #tpu.memory_space<vmem>>, vector<128x128xbf16>
    %cst_23 = arith.constant dense<0.000000e+00> : vector<2x128xf32>
    %59 = tpu.matmul %57, %58, %cst_23 {dimension_numbers = #tpu.dot_dimension_numbers<[1], [0], [0], [1], [0, 0, 1, 1], [], []>} : vector<2x128xbf16>, vector<128x128xbf16>, vector<2x128xf32> -> vector<2x128xf32>
    %c0_24 = arith.constant 0 : index
    %c0_25 = arith.constant 0 : index
    %60 = vector.load %arg6[%c0_24, %c0_25] : memref<1x128xf32, #tpu.memory_space<vmem>>, vector<1x128xf32>
    %61 = vector.broadcast %60 : vector<1x128xf32> to vector<2x128xf32>
    %62 = arith.addf %59, %61 : vector<2x128xf32>
    %c0_26 = arith.constant 0 : index
    %c0_27 = arith.constant 0 : index
    %63 = vector.load %arg7[%c0_26, %c0_27] : memref<2x128xf32, #tpu.memory_space<vmem>>, vector<2x128xf32>
    tpu.vector_store %arg7[%c0_26, %c0_27], %62 {strides = array<i32>} : memref<2x128xf32, #tpu.memory_space<vmem>>, vector<2x128xf32>,
    return
  }
  func.func @transform_0(%arg0: i32) -> (i32, i32) {
    %c0_i32 = arith.constant 0 : i32
    %c0_i32_0 = arith.constant 0 : i32
    return %arg0, %c0_i32 : i32, i32
  }
  func.func @transform_1(%arg0: i32) -> (i32, i32, i32) {
    %c0_i32 = arith.constant 0 : i32
    %c0_i32_0 = arith.constant 0 : i32
    %c0_i32_1 = arith.constant 0 : i32
    %c0_i32_2 = arith.constant 0 : i32
    return %c0_i32, %c0_i32_0, %c0_i32_1 : i32, i32, i32
  }
  func.func @transform_2(%arg0: i32) -> (i32, i32) {
    %c0_i32 = arith.constant 0 : i32
    %c0_i32_0 = arith.constant 0 : i32
    %c0_i32_1 = arith.constant 0 : i32
    return %c0_i32, %c0_i32_0 : i32, i32
  }
  func.func @transform_3(%arg0: i32) -> (i32, i32) {
    %c0_i32 = arith.constant 0 : i32
    %c0_i32_0 = arith.constant 0 : i32
    %c0_i32_1 = arith.constant 0 : i32
    return %c0_i32, %c0_i32_0 : i32, i32
  }
  func.func @transform_4(%arg0: i32) -> (i32, i32) {
    %c0_i32 = arith.constant 0 : i32
    %c0_i32_0 = arith.constant 0 : i32
    %c0_i32_1 = arith.constant 0 : i32
    return %c0_i32, %c0_i32_0 : i32, i32
  }
  func.func @transform_5(%arg0: i32) -> (i32, i32) {
    %c0_i32 = arith.constant 0 : i32
    %c0_i32_0 = arith.constant 0 : i32
    %c0_i32_1 = arith.constant 0 : i32
    return %c0_i32, %c0_i32_0 : i32, i32
  }
  func.func @transform_6(%arg0: i32) -> (i32, i32) {
    %c0_i32 = arith.constant 0 : i32
    %c0_i32_0 = arith.constant 0 : i32
    return %arg0, %c0_i32 : i32, i32
  }
}

</mosaic_0001>

<bundles_post_ra>
// kernel: tpu_custom_call.1
= control target key start
LH: loop header
LB: loop body
LE: loop exit
PB: predicated region body
PF: predicated region fallthrough
CT: control target
= control target key end

     0   :  { %11 = vsyncpa [#allocation3], 0  ;;  %s1309_s0 = inlined_call_operand.vmem [shape: s32[32,4], index: 0, kind: input, shape index: {}]   ;;  %s1310_s1 = inlined_call_operand.hbm [shape: bf16[4,128,128], index: 1, kind: input, shape index: {}]   ;;  %s1311_s2 = inlined_call_operand.vmem [shape: f32[1,128], index: 2, kind: input, shape index: {}]   ;;  %s1312_s3 = inlined_call_operand.vmem [shape: s32[1,128], index: 3, kind: input, shape index: {}]   ;;  %s1313_s4 = inlined_call_operand.hbm [shape: bf16[128,128], index: 4, kind: input, shape index: {}]   ;;  %s1314_s5 = inlined_call_operand.vmem [shape: f32[1,128], index: 5, kind: input, shape index: {}]   ;;  %s1315_s6 = inlined_call_operand.hbm [shape: f32[2,128], index: 6, kind: output, shape index: {}]  }
   0x1   :  { %12 = vsyncpa [#allocation6], 0 }
   0x2   :  { %13 = vsyncpa [#allocation4], 0  ;;  %s1177_s21 = smov [#allocation2]   ;;  %s1105_s25 = scalar_lea.hbm %s1310_s1, 4096 }
   0x3   :  { %s21_s22 = sshll.u32 %s1177_s21, 4  ;;  %p1106_p0 = scmp.ne.s32.totalorder %s1310_s1, %s1105_s25  ;;  %s22_s22 = int_to_ptr.vmem [resolvable:$true] %s21_s22 }
   0x4   :  { %p1109_p1 = scmp.lt.u32.totalorder %s1105_s25, %s1310_s1 }
   0x6   :  { %p1111_p2 = pnand %p1109_p1, %p1106_p0 }
   0x8   :  { %1114 = shalt.err (!%p1111_p2)
}
   0x9   :  { %s1115_s30 = scalar_lea.vmem %s22_s22, 4096  ;;  %p1120_p4 = scmp.lt.s32.totalorder %s22_s22, %s22_s22 }
   0xa   :  { %p1116_p3 = scmp.ne.s32.totalorder %s22_s22, %s1115_s30  ;;  %p1121_p5 = scmp.lt.s32.totalorder %s1115_s30, %s1115_s30 }
   0xc   :  { %p1122_p6 = por %p1121_p5, %p1120_p4 }
   0xe   :  { %p1123_p7 = pnand %p1122_p6, %p1116_p3 }
  0x10   :  { %1126 = shalt.err (!%p1123_p7)
}
  0x11   :  { %s1178_s7 = smov 64   ;;  %s1179_s8 = smov 4  }
  0x12   :  { %27 = dma.hbm_to_vmem [thread:$0]  %s1310_s1, 4096, %s22_s22, [#allocation3], %s1178_s7, %s1178_s7, %s1179_s8  }
  0x13   :  { %s1180_s11 = smov [#allocation5]   ;;  %s1127_s15 = scalar_lea.hbm %s1313_s4, 1024 }
  0x14   :  { %s37_s12 = sshll.u32 %s1180_s11, 4  ;;  %p1128_p8 = scmp.ne.s32.totalorder %s1313_s4, %s1127_s15  ;;  %s38_s12 = int_to_ptr.vmem [resolvable:$true] %s37_s12 }
  0x15   :  { %p1131_p9 = scmp.lt.u32.totalorder %s1127_s15, %s1313_s4 }
  0x17   :  { %p1133_p10 = pnand %p1131_p9, %p1128_p8 }
  0x19   :  { %1136 = shalt.err (!%p1133_p10)
}
  0x1a   :  { %s1137_s20 = scalar_lea.vmem %s38_s12, 1024  ;;  %p1142_p12 = scmp.lt.s32.totalorder %s38_s12, %s38_s12 }
  0x1b   :  { %p1138_p11 = scmp.ne.s32.totalorder %s38_s12, %s1137_s20  ;;  %p1143_p13 = scmp.lt.s32.totalorder %s1137_s20, %s1137_s20 }
  0x1d   :  { %p1144_p0 = por %p1143_p13, %p1142_p12 }
  0x1f   :  { %p1145_p1 = pnand %p1144_p0, %p1138_p11 }
  0x21   :  { %1148 = shalt.err (!%p1145_p1)
}
  0x22   :  { %43 = dma.hbm_to_vmem [thread:$0]  %s1313_s4, 1024, %s38_s12, [#allocation6], %s1178_s7, %s1178_s7, %s1179_s8  }
  0x23   :  { %1171 = dma.done.wait [#allocation3], 4096  }
  0x24   :  { %1172 = vsyncadd [#allocation3], 4294963200 }
  0x25   :  { %1173 = dma.done.wait [#allocation6], 1024  }
  0x26   :  { %1174 = vsyncadd [#allocation6], 4294966272  ;;  %v1181_v0 = vmov 0   ;;  %v55_v1 = vld [vmem:[%s1309_s0 + $0x10] sm:$0xff]  ;;  %v53_v2 = vld [vmem:[%s1309_s0] sm:$0xff]  ;;  %v1182_v8 = vmov 2   ;;  %v57_v25 = vlaneseq }
  0x27   :  { %1056 = vset.pattern.permute.xlu1 %v1181_v0  ;;  %1055 = vset.pattern.permute.xlu0 %v1181_v0  ;;  %v56_v3 = vld [vmem:[%s1309_s0 + $0x18] sm:$0xff]  ;;  %v54_v4 = vld [vmem:[%s1309_s0 + $0x8] sm:$0xff]  ;;  %v1065_v5 = vld [vmem:[#allocation2] sm:$0xff]   ;;  %v1183_v11 = vmov 1   ;;  %v1184_v13 = vmov 3   ;;  %v1186_v60 = vmov 0.0  }
  0x28   :  { %66 = vperm.xlu1 %1056, %v55_v1   ;;  %60 = vperm.xlu0 %1055, %v53_v2   ;;  %v1066_v6 = vld [vmem:[#allocation2 + $0x8] sm:$0xff]   ;;  %v1067_v7 = vld [vmem:[#allocation2 + $0x10] sm:$0xff]   ;;  %v1068_v9 = vld [vmem:[#allocation2 + $0x18] sm:$0xff]   ;;  %v1261_v28 = vand.u32 127, %v57_v25  ;;  %v1185_v32 = vmov 1.0|1.0  }
  0x29   :  { %951 = vmatprep.subr.bf16.mxu0 %v1065_v5  ;;  %v1069_v10 = vld [vmem:[#allocation2 + $0x20] sm:$0xff]   ;;  %v1070_v12 = vld [vmem:[#allocation2 + $0x28] sm:$0xff]   ;;  %v1071_v14 = vld [vmem:[#allocation2 + $0x30] sm:$0xff]   ;;  %s1188_s8 = smov [#allocation7]  }
  0x2a   :  { %952 = vmatpush3.bf16.msra.mxu0 %v1065_v5  ;;  %v1078_v15 = vld [vmem:[#allocation2 + $0x40] sm:$0xff]   ;;  %v1072_v16 = vld [vmem:[#allocation2 + $0x38] sm:$0xff]   ;;  %v1080_v17 = vld [vmem:[#allocation2 + $0x48] sm:$0xff]   ;;  %s797_s9 = sshll.u32 %s1188_s8, 4  ;;  %s798_s9 = int_to_ptr.vmem [resolvable:$true] %s797_s9 }
  0x2b   :  { %953 = vmatprep.subr.bf16.mxu0 %v1066_v6  ;;  %931 = vmatprep.subr.bf16.mxu1 %v1078_v15  ;;  %v1073_v18 = vld [vmem:[#allocation2 + $0x80] sm:$0xff]   ;;  %v1082_v19 = vld [vmem:[#allocation2 + $0x50] sm:$0xff]   ;;  %v1084_v20 = vld [vmem:[#allocation2 + $0x58] sm:$0xff]   ;;  %s1149_s10 = scalar_lea.vmem %s798_s9, 32  ;;  %p1154_p3 = scmp.lt.s32.totalorder %s798_s9, %s798_s9 }
  0x2c   :  { %69 = vperm.xlu1 %1056, %v56_v3   ;;  %63 = vperm.xlu0 %1055, %v54_v4   ;;  %v1086_v21 = vld [vmem:[#allocation2 + $0x60] sm:$0xff]   ;;  %v1088_v22 = vld [vmem:[#allocation2 + $0x68] sm:$0xff]   ;;  %v1090_v23 = vld [vmem:[#allocation2 + $0x70] sm:$0xff]   ;;  %p1150_p2 = scmp.ne.s32.totalorder %s798_s9, %s1149_s10  ;;  %p1155_p4 = scmp.lt.s32.totalorder %s1149_s10, %s1149_s10 }
  0x2d   :  { %932 = vmatpush3.bf16.msra.mxu1 %v1078_v15  ;;  %v1092_v24 = vld [vmem:[#allocation2 + $0x78] sm:$0xff]   ;;  %v1074_v31 = vld [vmem:[#allocation2 + $0x88] sm:$0xff]   ;;  %v1075_v35 = vld [vmem:[#allocation2 + $0x90] sm:$0xff]  }
  0x2e   :  { %954 = vmatpush3.bf16.msra.mxu0 %v1066_v6  ;;  %933 = vmatprep.subr.bf16.mxu1 %v1080_v17  ;;  %v1076_v38 = vld [vmem:[#allocation2 + $0x98] sm:$0xff]   ;;  %v1077_v41 = vld [vmem:[#allocation2 + $0xa0] sm:$0xff]   ;;  %v1079_v42 = vld [vmem:[#allocation2 + $0xa8] sm:$0xff]   ;;  %p1156_p5 = por %p1155_p4, %p1154_p3 }
  0x2f   :  { %955 = vmatprep.subr.bf16.mxu0 %v1067_v7  ;;  %v1081_v44 = vld [vmem:[#allocation2 + $0xb0] sm:$0xff]   ;;  %v1083_v47 = vld [vmem:[#allocation2 + $0xb8] sm:$0xff]   ;;  %v1085_v49 = vld [vmem:[#allocation2 + $0xc0] sm:$0xff]  }
  0x30   :  { %1058 = vset.pattern.permute.xlu1 %v1182_v8  ;;  %1057 = vset.pattern.permute.xlu0 %v1182_v8  ;;  %v1087_v50 = vld [vmem:[#allocation2 + $0xc8] sm:$0xff]   ;;  %v1089_v51 = vld [vmem:[#allocation2 + $0xd0] sm:$0xff]   ;;  %v1091_v52 = vld [vmem:[#allocation2 + $0xd8] sm:$0xff]   ;;  %v642_v8 = vshrl.u32 %v57_v25, 7  ;;  %p1157_p6 = pnand %p1156_p5, %p1150_p2 }
  0x31   :  { %342 = vperm.xlu1 %1058, %v54_v4   ;;  %339 = vperm.xlu0 %1057, %v53_v2   ;;  %v1093_v53 = vld [vmem:[#allocation2 + $0xe0] sm:$0xff]   ;;  %v1094_v54 = vld [vmem:[#allocation2 + $0xe8] sm:$0xff]   ;;  %v1095_v55 = vld [vmem:[#allocation2 + $0xf0] sm:$0xff]  }
  0x32   :  { %956 = vmatpush3.bf16.msra.mxu0 %v1067_v7  ;;  %934 = vmatpush3.bf16.msra.mxu1 %v1080_v17  ;;  %v1096_v56 = vld [vmem:[#allocation2 + $0xf8] sm:$0xff]   ;;  %v1097_v59 = vld [vmem:[#allocation5] sm:$0xff]   ;;  %v1098_v61 = vld [vmem:[#allocation5 + $0x8] sm:$0xff]   ;;  %v643_v15 = vadd.s32 8, %v642_v8 }
  0x33   :  { %957 = vmatprep.subr.bf16.mxu0 %v1068_v9  ;;  %935 = vmatprep.subr.bf16.mxu1 %v1082_v19  ;;  %v1099_v62 = vld [vmem:[#allocation5 + $0x10] sm:$0xff]   ;;  %v1100_v63 = vld [vmem:[#allocation5 + $0x18] sm:$0xff]   ;;  %v1101_v0 = vld [vmem:[#allocation5 + $0x20] sm:$0xff]  }
  0x34   :  { %v872_v17 = vld [vmem:[%s1312_s3] ss:$0 sm:$0xff] }
  0x35   :  { %345 = vperm.xlu1 %1058, %v55_v1   ;;  %348 = vperm.xlu0 %1057, %v56_v3  }
  0x36   :  { %958 = vmatpush3.bf16.msra.mxu0 %v1068_v9  ;;  %936 = vmatpush3.bf16.msra.mxu1 %v1082_v19 }
  0x37   :  { %959 = vmatprep.subr.bf16.mxu0 %v1069_v10  ;;  %937 = vmatprep.subr.bf16.mxu1 %v1084_v20 }
  0x39   :  { %1059 = vset.pattern.permute.xlu1 %v1183_v11  ;;  %1060 = vset.pattern.permute.xlu0 %v1183_v11 }
  0x3a   :  { %102 = vperm.xlu1 %1059, %v53_v2   ;;  %105 = vperm.xlu0 %1060, %v54_v4  }
  0x3b   :  { %960 = vmatpush3.bf16.msra.mxu0 %v1069_v10  ;;  %938 = vmatpush3.bf16.msra.mxu1 %v1084_v20  ;;  %v871_v10 = vld [vmem:[%s1311_s2] ss:$0 sm:$0xff] }
  0x3c   :  { %961 = vmatprep.subr.bf16.mxu0 %v1070_v12  ;;  %939 = vmatprep.subr.bf16.mxu1 %v1086_v21 }
  0x3e   :  { %1061 = vset.pattern.permute.xlu1 %v1184_v13  ;;  %108 = vperm.xlu0 %1060, %v55_v1  }
  0x3f   :  { %483 = vperm.xlu1 %1061, %v53_v2   ;;  %962 = vmatpush3.bf16.msra.mxu0 %v1070_v12  ;;  %v1103_v2 = vld [vmem:[#allocation5 + $0x30] sm:$0xff]  }
  0x40   :  { %963 = vmatprep.subr.bf16.mxu0 %v1071_v14  ;;  %940 = vmatpush3.bf16.msra.mxu1 %v1086_v21 }
  0x41   :  { %941 = vmatprep.subr.bf16.mxu1 %v1088_v22 }
  0x42   :  { %1063 = vset.pattern.permute.xlu0 %v1184_v13 }
  0x43   :  { %486 = vperm.xlu1 %1061, %v54_v4   ;;  %489 = vperm.xlu0 %1063, %v55_v1   ;;  %v1102_v1 = vld [vmem:[#allocation5 + $0x28] sm:$0xff]  }
  0x44   :  { %964 = vmatpush3.bf16.msra.mxu0 %v1071_v14  ;;  %942 = vmatpush3.bf16.msra.mxu1 %v1088_v22 }
  0x45   :  { %965 = vmatprep.subr.bf16.mxu0 %v1072_v16  ;;  %943 = vmatprep.subr.bf16.mxu1 %v1090_v23 }
  0x47   :  { %1062 = vset.pattern.permute.xlu1 %v1183_v11 }
  0x48   :  { %111 = vperm.xlu1 %1062, %v56_v3   ;;  %966 = vmatpush3.bf16.msra.mxu0 %v1072_v16 }
  0x49   :  { %971 = vmatprep.subr.bf16.mxu0 %v1073_v18  ;;  %944 = vmatpush3.bf16.msra.mxu1 %v1090_v23 }
  0x4a   :  { %945 = vmatprep.subr.bf16.mxu1 %v1092_v24 }
  0x4c   :  { %1064 = vset.pattern.permute.xlu1 %v1184_v13 }
  0x4d   :  { %492 = vperm.xlu1 %1064, %v56_v3   ;;  %946 = vmatpush3.bf16.msra.mxu1 %v1092_v24  ;;  %v1104_v3 = vld [vmem:[#allocation5 + $0x38] sm:$0xff]  }
  0x4e   :  { %1011 = vmatprep.subr.bf16.mxu1 %v1186_v60 }
  0xa7   :  { %v67_v26 = vpop.permute.xlu1 %66  ;;  %v61_v27 = vpop.permute.xlu0 %60 }
  0xa8   :  { %vm73_vm0 = vcmp.eq.s32.totalorder %v1261_v28, %v67_v26  ;;  %vm71_vm3 = vcmp.eq.s32.totalorder %v1261_v28, %v61_v27 }
  0xab   :  { %v70_v29 = vpop.permute.xlu1 %69  ;;  %v64_v30 = vpop.permute.xlu0 %63 }
  0xac   :  { %vm74_vm1 = vcmp.eq.s32.totalorder %v1261_v28, %v70_v29  ;;  %vm72_vm2 = vcmp.eq.s32.totalorder %v1261_v28, %v64_v30 }
  0xad   :  { %vm837_vm4 = vmpackc.low %vm74_vm1, %vm73_vm0 }
  0xae   :  { %vm835_vm5 = vmpackc.low %vm72_vm2, %vm71_vm3 }
  0xaf   :  { %967 = vmatprep.mubr.msk.bf16.mxu0 %vm835_vm5, %v1185_v32 }
  0xb0   :  { %968 = vmatmul.mubr.msk.bf16.vlgmr.msra.gmra.mrb[0].mxu0 %vm837_vm4, %v1185_v32  ;;  %v343_v33 = vpop.permute.xlu1 %342  ;;  %v340_v34 = vpop.permute.xlu0 %339 }
  0xb1   :  { %972 = vmatpush3.bf16.msra.mxu0 %v1073_v18  ;;  %vm351_vm6 = vcmp.eq.s32.totalorder %v1261_v28, %v343_v33  ;;  %vm350_vm7 = vcmp.eq.s32.totalorder %v1261_v28, %v340_v34 }
  0xb2   :  { %973 = vmatprep.subr.bf16.mxu0 %v1074_v31  ;;  %vm851_vm8 = vmpackc.low %vm351_vm6, %vm350_vm7 }
  0xb3   :  { %987 = vmatprep.mubr.msk.bf16.mxu0 %vm851_vm8, %v1185_v32  ;;  %vm1187_vm8 = vmmov 0  }
  0xb4   :  { %v346_v36 = vpop.permute.xlu1 %345  ;;  %v349_v37 = vpop.permute.xlu0 %348 }
  0xb5   :  { %974 = vmatpush3.bf16.msra.mxu0 %v1074_v31  ;;  %vm352_vm1 = vcmp.eq.s32.totalorder %v1261_v28, %v346_v36  ;;  %vm353_vm2 = vcmp.eq.s32.totalorder %v1261_v28, %v349_v37 }
  0xb6   :  { %975 = vmatprep.subr.bf16.mxu0 %v1075_v35  ;;  %vm853_vm4 = vmpackc.low %vm353_vm2, %vm352_vm1 }
  0xb9   :  { %976 = vmatpush3.bf16.msra.mxu0 %v1075_v35  ;;  %v103_v39 = vpop.permute.xlu1 %102  ;;  %v106_v40 = vpop.permute.xlu0 %105 }
  0xba   :  { %977 = vmatprep.subr.bf16.mxu0 %v1076_v38  ;;  %vm113_vm9 = vcmp.eq.s32.totalorder %v1261_v28, %v103_v39  ;;  %vm114_vm10 = vcmp.eq.s32.totalorder %v1261_v28, %v106_v40 }
  0xbb   :  { %vm823_vm11 = vmpackc.low %vm114_vm10, %vm113_vm9  ;;  %vm649_vm9 = vcmp.le.s32.totalorder %v642_v8, %v872_v17  ;;  %vm650_vm10 = vcmp.le.s32.totalorder %v643_v15, %v872_v17 }
  0xbc   :  { %947 = vmatprep.mubr.msk.bf16.mxu1 %vm823_vm11, %v1185_v32  ;;  %vm698_vm11 = vcmask 1041409  }
  0xbd   :  { %978 = vmatpush3.bf16.msra.mxu0 %v1076_v38  ;;  %v109_v46 = vpop.permute.xlu0 %108 }
  0xbe   :  { %979 = vmatprep.subr.bf16.mxu0 %v1077_v41  ;;  %v484_v43 = vpop.permute.xlu1 %483  ;;  %vm115_vm12 = vcmp.eq.s32.totalorder %v1261_v28, %v109_v46 }
  0xbf   :  { %vm494_vm15 = vcmp.eq.s32.totalorder %v1261_v28, %v484_v43 }
  0xc1   :  { %980 = vmatpush3.bf16.msra.mxu0 %v1077_v41 }
  0xc2   :  { %981 = vmatprep.subr.bf16.mxu0 %v1079_v42  ;;  %v487_v45 = vpop.permute.xlu1 %486  ;;  %v490_v58 = vpop.permute.xlu0 %489 }
  0xc3   :  { %vm495_vm0 = vcmp.eq.s32.totalorder %v1261_v28, %v487_v45  ;;  %vm496_vm6 = vcmp.eq.s32.totalorder %v1261_v28, %v490_v58 }
  0xc4   :  { %vm867_vm3 = vmpackc.low %vm495_vm0, %vm494_vm15 }
  0xc5   :  { %982 = vmatpush3.bf16.msra.mxu0 %v1079_v42 }
  0xc6   :  { %983 = vmatprep.subr.bf16.mxu0 %v1081_v44 }
  0xc7   :  { %v112_v48 = vpop.permute.xlu1 %111 }
  0xc8   :  { %vm116_vm13 = vcmp.eq.s32.totalorder %v1261_v28, %v112_v48 }
  0xc9   :  { %984 = vmatpush3.bf16.msra.mxu0 %v1081_v44  ;;  %vm825_vm14 = vmpackc.low %vm116_vm13, %vm115_vm12 }
  0xca   :  { %985 = vmatprep.subr.bf16.mxu0 %v1083_v47  ;;  %948 = vmatmul.mubr.msk.bf16.vlgmr.msra.gmra.mrb[0].mxu1 %vm825_vm14, %v1185_v32 }
  0xcb   :  { %1012 = vmatpush3.bf16.msra.mxu1 %v1097_v59  ;;  %1027 = vmatprep.mubr.msk.bf16.mxu1 %vm1187_vm8, %v1186_v60 }
  0xcc   :  { %v493_v57 = vpop.permute.xlu1 %492  ;;  %1013 = vmatprep.subr.bf16.mxu1 %v1186_v60 }
  0xcd   :  { %986 = vmatpush3.bf16.msra.mxu0 %v1083_v47  ;;  %vm497_vm5 = vcmp.eq.s32.totalorder %v1261_v28, %v493_v57 }
  0xce   :  { %991 = vmatprep.subr.bf16.mxu0 %v1085_v49  ;;  %vm869_vm7 = vmpackc.low %vm497_vm5, %vm496_vm6 }
  0xcf   :  { %1014 = vmatpush3.bf16.msra.mxu1 %v1098_v61 }
  0xd0   :  { %988 = vmatmul.mubr.msk.bf16.vlgmr.msra.gmra.mrb[0].mxu0 %vm853_vm4, %v1185_v32  ;;  %1015 = vmatprep.subr.bf16.mxu1 %v1186_v60 }
  0xd1   :  { %992 = vmatpush3.bf16.msra.mxu0 %v1085_v49  ;;  %1007 = vmatprep.mubr.msk.bf16.mxu0 %vm867_vm3, %v1185_v32 }
  0xd2   :  { %993 = vmatprep.subr.bf16.mxu0 %v1087_v50 }
  0xd3   :  { %1016 = vmatpush3.bf16.msra.mxu1 %v1099_v62 }
  0xd4   :  { %1017 = vmatprep.subr.bf16.mxu1 %v1186_v60 }
  0xd5   :  { %994 = vmatpush3.bf16.msra.mxu0 %v1087_v50 }
  0xd6   :  { %995 = vmatprep.subr.bf16.mxu0 %v1089_v51 }
  0xd7   :  { %1018 = vmatpush3.bf16.msra.mxu1 %v1100_v63 }
  0xd8   :  { %1019 = vmatprep.subr.bf16.mxu1 %v1186_v60 }
  0xd9   :  { %996 = vmatpush3.bf16.msra.mxu0 %v1089_v51 }
  0xda   :  { %997 = vmatprep.subr.bf16.mxu0 %v1091_v52 }
  0xdb   :  { %1020 = vmatpush3.bf16.msra.mxu1 %v1101_v0 }
  0xdc   :  { %1021 = vmatprep.subr.bf16.mxu1 %v1186_v60 }
  0xdd   :  { %998 = vmatpush3.bf16.msra.mxu0 %v1091_v52  ;;  %v873_v52 = vld [vmem:[%s1314_s5] ss:$0 sm:$0xff] }
  0xde   :  { %999 = vmatprep.subr.bf16.mxu0 %v1093_v53 }
  0xdf   :  { %1022 = vmatpush3.bf16.msra.mxu1 %v1102_v1 }
  0xe0   :  { %1023 = vmatprep.subr.bf16.mxu1 %v1186_v60 }
  0xe1   :  { %1000 = vmatpush3.bf16.msra.mxu0 %v1093_v53 }
  0xe2   :  { %1001 = vmatprep.subr.bf16.mxu0 %v1094_v54 }
  0xe3   :  { %1024 = vmatpush3.bf16.msra.mxu1 %v1103_v2 }
  0xe4   :  { %1025 = vmatprep.subr.bf16.mxu1 %v1186_v60 }
  0xe5   :  { %1002 = vmatpush3.bf16.msra.mxu0 %v1094_v54 }
  0xe6   :  { %1003 = vmatprep.subr.bf16.mxu0 %v1095_v55 }
  0xe7   :  { %1026 = vmatpush3.bf16.msra.mxu1 %v1104_v3 }
  0xe9   :  { %1004 = vmatpush3.bf16.msra.mxu0 %v1095_v55 }
  0xea   :  { %1005 = vmatprep.subr.bf16.mxu0 %v1096_v56 }
  0xed   :  { %1006 = vmatpush3.bf16.msra.mxu0 %v1096_v56 }
  0xf0   :  { %1008 = vmatmul.mubr.msk.bf16.vlgmr.msra.gmra.mrb[0].mxu0 %vm869_vm7, %v1185_v32 }
 0x19d   :  { %v949_v4 = vpop.f32.mrb[0].mxu1 }
 0x19e   :  { %v226_v5 = vpop.f32.mrb[1].mxu1 }
 0x19f   :  { %v950_v6 = vpop.f32.mrb[2].mxu1 }
 0x1a0   :  { %v229_v7 = vpop.f32.mrb[3].mxu1 }
 0x1c3   :  { %v1009_v9 = vpop.f32.mrb[0].mxu0 }
 0x1c4   :  { %v1031_v11 = vadd.f32 %v1009_v9, %v949_v4  ;;  %v607_v12 = vpop.f32.mrb[1].mxu0 }
 0x1c5   :  { %v1032_v13 = vadd.f32 %v607_v12, %v226_v5  ;;  %v1010_v14 = vpop.f32.mrb[2].mxu0 }
 0x1c6   :  { %v635_v16 = vadd.f32 %v1031_v11, %v871_v10  ;;  %v1033_v18 = vadd.f32 %v1010_v14, %v950_v6  ;;  %v610_v19 = vpop.f32.mrb[3].mxu0 }
 0x1c7   :  { %v633_v20 = vadd.f32 %v1032_v13, %v871_v10  ;;  %v1034_v21 = vadd.f32 %v610_v19, %v229_v7 }
 0x1c8   :  { %v639_v22 = vmax.f32 %v635_v16, 0.0  ;;  %v636_v23 = vadd.f32 %v1033_v18, %v871_v10 }
 0x1c9   :  { %v637_v24 = vmax.f32 %v633_v20, 0.0  ;;  %v634_v25 = vadd.f32 %v1034_v21, %v871_v10 }
 0x1ca   :  { %v640_v26 = vmax.f32 %v636_v23, 0.0  ;;  %v653_v28 = vsel %vm649_vm9, %v639_v22, 0.0 }
 0x1cb   :  { %v638_v27 = vmax.f32 %v634_v25, 0.0  ;;  %v651_v30 = vsel %vm649_vm9, %v637_v24, 0.0 }
 0x1cc   :  { %v654_v29 = vsel %vm650_vm10, %v640_v26, 0.0 }
 0x1cd   :  { %v662_v31 = vmax.f32 %v653_v28, %v654_v29  ;;  %v652_v32 = vsel %vm650_vm10, %v638_v27, 0.0 }
 0x1ce   :  { %v655_v33 = vmax.f32 %v651_v30, %v652_v32 }
 0x1cf   :  { %v663_v34 = vrot.slane %v662_v31, 4 }
 0x1d0   :  { %v656_v35 = vrot.slane %v655_v33, 4 }
 0x1d1   :  { %v664_v36 = vmax.f32 %v662_v31, %v663_v34 }
 0x1d2   :  { %v657_v37 = vmax.f32 %v655_v33, %v656_v35 }
 0x1d3   :  { %v665_v38 = vrot.slane %v664_v36, 2 }
 0x1d4   :  { %v658_v39 = vrot.slane %v657_v37, 2 }
 0x1d5   :  { %v666_v40 = vmax.f32 %v664_v36, %v665_v38 }
 0x1d6   :  { %v659_v41 = vmax.f32 %v657_v37, %v658_v39 }
 0x1d7   :  { %v667_v42 = vrot.slane %v666_v40, 1 }
 0x1d8   :  { %v660_v43 = vrot.slane %v659_v41, 1 }
 0x1d9   :  { %v668_v44 = vmax.f32 %v666_v40, %v667_v42 }
 0x1da   :  { %v661_v45 = vmax.f32 %v659_v41, %v660_v43 }
 0x1db   :  { %v670_v46 = vpack.c.bf16 %v668_v44, %v668_v44 }
 0x1dc   :  { %v669_v47 = vpack.c.bf16 %v661_v45, %v661_v45 }
 0x1dd   :  { %v697_v48 = vunpack.c.l.b16 %v670_v46 }
 0x1de   :  { %v696_v49 = vunpack.c.l.b16 %v669_v47 }
 0x1e0   :  { %v699_v50 = vsel %vm698_vm11, %v697_v48, %v696_v49 }
 0x1e1   :  { %v700_v51 = vpack.c.b16 %v699_v50, %v699_v50 }
 0x1e3   :  { %1028 = vmatmul.mubr.bf16.vlgmr.msra.gmra.mrb[4].mxu1 %v700_v51 }
 0x2b6   :  { %v784_v53 = vpop.f32.mrb[4].mxu1 }
 0x2b7   :  { %v785_v54 = vadd.f32 %v873_v52, %v784_v53  ;;  %v1029_v55 = vpop.f32.mrb[5].mxu1 }
 0x2b8   :  { %v787_v56 = vpop.f32.mrb[6].mxu1 }
 0x2b9   :  { %790 = vst [vmem:[#allocation7] sm:$0x3] %v785_v54  ;;  %v1030_v57 = vpop.f32.mrb[7].mxu1 }
 0x2ba   :  { %1160 = shalt.err (!%p1157_p6)
}
 0x2bb   :  { %s1161_s5 = scalar_lea.hbm %s1315_s6, 32 }
 0x2bc   :  { %p1162_p7 = scmp.ne.s32.totalorder %s1315_s6, %s1161_s5  ;;  %p1165_p8 = scmp.lt.u32.totalorder %s1161_s5, %s1315_s6 }
 0x2be   :  { %p1167_p9 = pnand %p1165_p8, %p1162_p7 }
 0x2c0   :  { %1170 = shalt.err (!%p1167_p9)
}
 0x2c1   :  { %800 = dma.vmem_to_hbm [thread:$0]  %s798_s9, 32, %s1315_s6, [#allocation4]  }
 0x2c2   :  { %1175 = dma.done.wait [#allocation4], 32  }
 0x2c3   :  { %1176 = vsyncadd [#allocation4], 4294967264 }
 0x2c4   :  { %804 = vsyncpa [#allocation3], 1 }
 0x2c5   :  { %805 = vsyncpa [#allocation6], 1 }
 0x2c6   :  { %806 = vsyncpa [#allocation4], 1 }

</bundles_post_ra>
